<compile_context>
chip_gen: v7x
topology: tpu7x:2x2x1
jax: 0.10.0
libtpu: 0.0.40
codegen_flags: <defaults>
</compile_context>

<pallas_src>
import jax
import jax.numpy as jnp
from jax.experimental import pallas as pl
from jax.experimental.pallas import tpu as pltpu


def critic_kernel(xT_ref, w_ref, o_ref):
    # xT_ref: (K, Bt)   input features, batch along lanes
    # w_ref : (H, K+3)  [:, :K] = W1^T, [:, K] = b1, [:, K+1] = w2, [0, K+2] = b2
    # o_ref : (1, Bt)   lane-dense value row
    xT = xT_ref[...]
    w = w_ref[...]
    K = xT.shape[0]

    # Hidden layer on the VPU (no MXU): h[f, b] = b1[f] + sum_k W1[k, f] * x[b, k]
    h = w[:, K:K + 1] + w[:, 0:1] * xT[0:1, :]
    for k in range(1, K):                      # K is static -> unrolled at trace time
        h = h + w[:, k:k + 1] * xT[k:k + 1, :]
    h = jnp.maximum(h, 0.0)                    # ReLU

    # Value head: VPU multiply + cross-sublane reduce (XLU); avoids a 1-wide matmul.
    o = jnp.sum(w[:, K + 1:K + 2] * h, axis=0, keepdims=True) + w[0:1, K + 2:K + 3]
    o_ref[...] = o.astype(o_ref.dtype)


def critic_forward(x, w1, b1, w2, b2, *, block_b=512):
    """Critic forward. x: (B, K) -> (B, 1).

    Weights stored features-last (as torch.nn.Linear transposed):
      w1 (K, H), b1 (H,), w2 (H, 1), b2 (1,).
    """
    B, K = x.shape
    H = w1.shape[1]
    f32 = jnp.float32

    # Pack all parameters into a single (H, K+3) array: one weight DMA,
    # grid-invariant so it stays VMEM-resident across batch tiles.
    b2_col = jnp.zeros((H, 1), f32).at[0, 0].set(jnp.reshape(b2, ()).astype(f32))
    wpack = jnp.concatenate(
        [w1.astype(f32).T,
         jnp.reshape(b1, (H, 1)).astype(f32),
         jnp.reshape(w2, (H, 1)).astype(f32),
         b2_col],
        axis=1)                                             # (H, K+3)

    # Batch along lanes: present activations as (K, B) (layout plumbing only).
    xT = x.astype(f32).T                                    # (K, B)

    if B <= block_b:
        bt, Bp = B, B                                       # single block, no padding
    else:
        bt = block_b                                        # multiple of 128
        Bp = pl.cdiv(B, bt) * bt
        xT = jnp.pad(xT, ((0, 0), (0, Bp - B)))
    grid = (Bp // bt,)

    out_row = pl.pallas_call(
        critic_kernel,
        out_shape=jax.ShapeDtypeStruct((1, Bp), f32),
        grid_spec=pltpu.PrefetchScalarGridSpec(
            num_scalar_prefetch=0,
            grid=grid,
            in_specs=[
                pl.BlockSpec((K, bt), lambda i: (0, i)),        # streamed batch tile
                pl.BlockSpec((H, K + 3), lambda i: (0, 0)),     # weights, VMEM-resident
            ],
            out_specs=pl.BlockSpec((1, bt), lambda i: (0, i)),  # lane-dense output row
        ),
        compiler_params=pltpu.CompilerParams(
            dimension_semantics=("parallel",)),                 # shards tiles on v7x
    )(xT, wpack)

    return out_row[0, :B].reshape(B, 1)


def init_critic_params(key, num_inputs, hidden):
    """Deterministic init mimicking torch.nn.Linear (uniform +-1/sqrt(fan_in))."""
    k1, k2, k3, k4 = jax.random.split(key, 4)
    bound1 = 1.0 / jnp.sqrt(jnp.float32(num_inputs))
    bound2 = 1.0 / jnp.sqrt(jnp.float32(hidden))
    w1 = jax.random.uniform(k1, (num_inputs, hidden), jnp.float32, -bound1, bound1)
    b1 = jax.random.uniform(k2, (hidden,), jnp.float32, -bound1, bound1)
    w2 = jax.random.uniform(k3, (hidden, 1), jnp.float32, -bound2, bound2)
    b2 = jax.random.uniform(k4, (1,), jnp.float32, -bound2, bound2)
    return w1, b1, w2, b2


def _reference(x, w1, b1, w2, b2):
    return jnp.maximum(x @ w1 + b1[None, :], 0.0) @ w2 + b2[None, :]


if __name__ == "__main__":
    NUM_INPUTS, HIDDEN = 4, 32   # CartPole-v1 observation dim, small hidden
    key = jax.random.PRNGKey(0)
    k_x, k_p, k_x2 = jax.random.split(key, 3)
    w1, b1, w2, b2 = init_critic_params(k_p, NUM_INPUTS, HIDDEN)

    # Small per-step batch (single-block path).
    B = 8
    x = jax.random.normal(k_x, (B, NUM_INPUTS), dtype=jnp.float32)
    out = jax.block_until_ready(critic_forward(x, w1, b1, w2, b2))
    ref = _reference(x, w1, b1, w2, b2)
    assert out.shape == (B, 1)
    assert jnp.allclose(out, ref, atol=1e-5, rtol=1e-5)

    # Larger rollout batch (gridded + padded path, weights stay VMEM-resident).
    B2 = 1000
    x2 = jax.random.normal(k_x2, (B2, NUM_INPUTS), dtype=jnp.float32)
    out2 = jax.block_until_ready(critic_forward(x2, w1, b1, w2, b2))
    ref2 = _reference(x2, w1, b1, w2, b2)
    assert out2.shape == (B2, 1)
    assert jnp.allclose(out2, ref2, atol=1e-5, rtol=1e-5)

    print("KERNEL_OK")
</pallas_src>

<mosaic_0001>
module attributes {stable_mosaic.version = 11 : i64} {
  func.func @critic_kernel(%arg0: i32, %arg1: memref<4x8xf32, #tpu.memory_space<vmem>>, %arg2: memref<32x7xf32, #tpu.memory_space<vmem>>, %arg3: memref<1x8xf32, #tpu.memory_space<vmem>>) attributes {dimension_semantics = [#tpu.dimension_semantics<parallel>], iteration_bounds = array<i64: 1>, scalar_prefetch = 0 : i64, scratch_operands = 0 : i64, tpu.core_type = #tpu.core_type<tc>, window_params = [{transform_indices = @transform_0, window_bounds = array<i64: 4, 8>}, {pipeline_mode = #tpu.pipeline_mode<synchronous>, transform_indices = @transform_1, window_bounds = array<i64: 32, 7>}, {transform_indices = @transform_2, window_bounds = array<i64: 1, 8>}]} {
    %c0 = arith.constant 0 : index
    %c0_0 = arith.constant 0 : index
    %0 = vector.load %arg1[%c0, %c0_0] : memref<4x8xf32, #tpu.memory_space<vmem>>, vector<4x8xf32>
    %c0_1 = arith.constant 0 : index
    %c0_2 = arith.constant 0 : index
    %1 = vector.load %arg2[%c0_1, %c0_2] : memref<32x7xf32, #tpu.memory_space<vmem>>, vector<32x7xf32>
    %2 = vector.extract_strided_slice %1 {offsets = [0, 4], sizes = [32, 1], strides = [1, 1]} : vector<32x7xf32> to vector<32x1xf32>
    %3 = vector.extract_strided_slice %1 {offsets = [0, 0], sizes = [32, 1], strides = [1, 1]} : vector<32x7xf32> to vector<32x1xf32>
    %4 = vector.extract_strided_slice %0 {offsets = [0, 0], sizes = [1, 8], strides = [1, 1]} : vector<4x8xf32> to vector<1x8xf32>
    %5 = vector.broadcast %3 : vector<32x1xf32> to vector<32x8xf32>
    %6 = vector.broadcast %4 : vector<1x8xf32> to vector<32x8xf32>
    %7 = arith.mulf %5, %6 : vector<32x8xf32>
    %8 = vector.broadcast %2 : vector<32x1xf32> to vector<32x8xf32>
    %9 = arith.addf %8, %7 : vector<32x8xf32>
    %10 = vector.extract_strided_slice %1 {offsets = [0, 1], sizes = [32, 1], strides = [1, 1]} : vector<32x7xf32> to vector<32x1xf32>
    %11 = vector.extract_strided_slice %0 {offsets = [1, 0], sizes = [1, 8], strides = [1, 1]} : vector<4x8xf32> to vector<1x8xf32>
    %12 = vector.broadcast %10 : vector<32x1xf32> to vector<32x8xf32>
    %13 = vector.broadcast %11 : vector<1x8xf32> to vector<32x8xf32>
    %14 = arith.mulf %12, %13 : vector<32x8xf32>
    %15 = arith.addf %9, %14 : vector<32x8xf32>
    %16 = vector.extract_strided_slice %1 {offsets = [0, 2], sizes = [32, 1], strides = [1, 1]} : vector<32x7xf32> to vector<32x1xf32>
    %17 = vector.extract_strided_slice %0 {offsets = [2, 0], sizes = [1, 8], strides = [1, 1]} : vector<4x8xf32> to vector<1x8xf32>
    %18 = vector.broadcast %16 : vector<32x1xf32> to vector<32x8xf32>
    %19 = vector.broadcast %17 : vector<1x8xf32> to vector<32x8xf32>
    %20 = arith.mulf %18, %19 : vector<32x8xf32>
    %21 = arith.addf %15, %20 : vector<32x8xf32>
    %22 = vector.extract_strided_slice %1 {offsets = [0, 3], sizes = [32, 1], strides = [1, 1]} : vector<32x7xf32> to vector<32x1xf32>
    %23 = vector.extract_strided_slice %0 {offsets = [3, 0], sizes = [1, 8], strides = [1, 1]} : vector<4x8xf32> to vector<1x8xf32>
    %24 = vector.broadcast %22 : vector<32x1xf32> to vector<32x8xf32>
    %25 = vector.broadcast %23 : vector<1x8xf32> to vector<32x8xf32>
    %26 = arith.mulf %24, %25 : vector<32x8xf32>
    %27 = arith.addf %21, %26 : vector<32x8xf32>
    %cst = arith.constant 0.000000e+00 : f32
    %28 = vector.broadcast %cst : f32 to vector<32x8xf32>
    %29 = arith.maximumf %27, %28 : vector<32x8xf32>
    %30 = vector.extract_strided_slice %1 {offsets = [0, 5], sizes = [32, 1], strides = [1, 1]} : vector<32x7xf32> to vector<32x1xf32>
    %31 = vector.broadcast %30 : vector<32x1xf32> to vector<32x8xf32>
    %32 = arith.mulf %31, %29 : vector<32x8xf32>
    %cst_3 = arith.constant dense<0.000000e+00> : vector<8xf32>
    %33 = vector.multi_reduction <add>, %32, %cst_3 [0] : vector<32x8xf32> to vector<8xf32>
    %34 = vector.shape_cast %33 : vector<8xf32> to vector<1x8xf32>
    %35 = vector.extract_strided_slice %1 {offsets = [0, 6], sizes = [1, 1], strides = [1, 1]} : vector<32x7xf32> to vector<1x1xf32>
    %36 = vector.broadcast %35 : vector<1x1xf32> to vector<1x8xf32>
    %37 = arith.addf %34, %36 : vector<1x8xf32>
    %c0_4 = arith.constant 0 : index
    %c0_5 = arith.constant 0 : index
    %38 = vector.load %arg3[%c0_4, %c0_5] : memref<1x8xf32, #tpu.memory_space<vmem>>, vector<1x8xf32>
    tpu.vector_store %arg3[%c0_4, %c0_5], %37 {strides = array<i32>} : memref<1x8xf32, #tpu.memory_space<vmem>>, vector<1x8xf32>,
    return
  }
  func.func @transform_0(%arg0: i32) -> (i32, i32) {
    %c0_i32 = arith.constant 0 : i32
    %c0_i32_0 = arith.constant 0 : i32
    return %c0_i32, %arg0 : i32, i32
  }
  func.func @transform_1(%arg0: i32) -> (i32, i32) {
    %c0_i32 = arith.constant 0 : i32
    %c0_i32_0 = arith.constant 0 : i32
    %c0_i32_1 = arith.constant 0 : i32
    return %c0_i32, %c0_i32_0 : i32, i32
  }
  func.func @transform_2(%arg0: i32) -> (i32, i32) {
    %c0_i32 = arith.constant 0 : i32
    %c0_i32_0 = arith.constant 0 : i32
    return %c0_i32, %arg0 : i32, i32
  }
}

</mosaic_0001>

<bundles_post_ra>
// kernel: tpu_custom_call.1
= control target key start
LH: loop header
LB: loop body
LE: loop exit
PB: predicated region body
PF: predicated region fallthrough
CT: control target
= control target key end

     0   :  { %v259_v2 = vmov 4   ;;  %v260_v3 = vmov 0   ;;  %s309_s0 = inlined_call_operand.vmem [shape: f32[4,8], index: 0, kind: input, shape index: {}]   ;;  %s310_s1 = inlined_call_operand.vmem [shape: f32[32,7], index: 1, kind: input, shape index: {}]   ;;  %s311_s2 = inlined_call_operand.hbm [shape: f32[1,8], index: 2, kind: output, shape index: {}]  }
   0x1   :  { %v15_v0 = vld [vmem:[%s310_s1 + $0x10] sm:$0xff]  ;;  %v14_v1 = vld [vmem:[%s310_s1 + $0x8] sm:$0xff]  ;;  %218 = vset.pattern.permute.xlu0 %v259_v2  ;;  %216 = vset.pattern.permute.xlu1 %v260_v3 }
   0x2   :  { %29 = vperm.xlu1 %216, %v15_v0   ;;  %50 = vperm.xlu0 %218, %v14_v1  }
   0x3   :  { %7 = vsyncpa [#allocation3], 0  ;;  %v13_v4 = vld [vmem:[%s310_s1] sm:$0xff]  ;;  %v261_v5 = vmov 1   ;;  %v16_v6 = vld [vmem:[%s310_s1 + $0x18] sm:$0xff]  ;;  %v262_v7 = vmov 2   ;;  %v37_v20 = vlaneseq }
   0x4   :  { %v263_v8 = vmov 3   ;;  %v264_v9 = vmov 5   ;;  %v265_v10 = vmov 6   ;;  %v12_v26 = vld [vmem:[%s309_s0] sm:$0xf]  ;;  %vm173_vm0 = vcmask 64512  }
   0x5   :  { %v38_v22 = vshrl.u32 %v37_v20, 7  ;;  %s266_s0 = smov [#allocation2]   ;;  %vm192_vm1 = vcmask 57344  }
   0x6   :  { %217 = vset.pattern.permute.xlu1 %v259_v2  ;;  %219 = vset.pattern.permute.xlu0 %v260_v3  ;;  %s200_s18 = sshll.u32 %s266_s0, 4  ;;  %s201_s18 = int_to_ptr.vmem [resolvable:$true] %s200_s18 }
   0x7   :  { %19 = vperm.xlu0 %219, %v13_v4   ;;  %46 = vperm.xlu1 %217, %v13_v4   ;;  %v39_v24 = vsub.s32 0, %v38_v22  ;;  %v83_v27 = vsub.s32 1, %v38_v22  ;;  %v111_v32 = vsub.s32 2, %v38_v22  ;;  %v139_v35 = vsub.s32 3, %v38_v22  ;;  %s235_s19 = scalar_lea.vmem %s201_s18, 16  ;;  %s239_s20 = scalar_lea.vmem %s201_s18, 32 }
   0x8   :  { %p236_p0 = scmp.ne.s32.totalorder %s201_s18, %s235_s19  ;;  %p240_p1 = scmp.lt.s32.totalorder %s201_s18, %s201_s18 }
   0x9   :  { %v40_v29 = vrot.slane %v12_v26, %v39_v24  ;;  %v84_v33 = vrot.slane %v12_v26, %v83_v27  ;;  %v112_v39 = vrot.slane %v12_v26, %v111_v32  ;;  %v140_v42 = vrot.slane %v12_v26, %v139_v35  ;;  %p241_p2 = scmp.lt.s32.totalorder %s239_s20, %s235_s19 }
   0xb   :  { %24 = vperm.xlu0 %219, %v14_v1   ;;  %220 = vset.pattern.permute.xlu1 %v261_v5  ;;  %p242_p3 = por %p241_p2, %p240_p1 }
   0xc   :  { %66 = vperm.xlu1 %220, %v13_v4  }
   0xd   :  { %p243_p4 = pnand %p242_p3, %p236_p0 }
   0xf   :  { %34 = vperm.xlu0 %219, %v16_v6  }
  0x10   :  { %70 = vperm.xlu1 %220, %v14_v1  }
  0x13   :  { %223 = vset.pattern.permute.xlu0 %v262_v7 }
  0x14   :  { %94 = vperm.xlu0 %223, %v13_v4   ;;  %221 = vset.pattern.permute.xlu1 %v259_v2 }
  0x15   :  { %54 = vperm.xlu1 %221, %v15_v0  }
  0x18   :  { %226 = vset.pattern.permute.xlu0 %v261_v5 }
  0x19   :  { %78 = vperm.xlu0 %226, %v16_v6   ;;  %222 = vset.pattern.permute.xlu1 %v261_v5 }
  0x1a   :  { %74 = vperm.xlu1 %222, %v15_v0  }
  0x1d   :  { %229 = vset.pattern.permute.xlu0 %v263_v8 }
  0x1e   :  { %126 = vperm.xlu0 %229, %v14_v1   ;;  %224 = vset.pattern.permute.xlu1 %v262_v7 }
  0x1f   :  { %98 = vperm.xlu1 %224, %v14_v1  }
  0x22   :  { %134 = vperm.xlu0 %229, %v16_v6  }
  0x23   :  { %225 = vset.pattern.permute.xlu1 %v259_v2 }
  0x24   :  { %58 = vperm.xlu1 %225, %v16_v6  }
  0x26   :  { %233 = vset.pattern.permute.xlu0 %v264_v9 }
  0x27   :  { %158 = vperm.xlu0 %233, %v14_v1  }
  0x28   :  { %227 = vset.pattern.permute.xlu1 %v262_v7 }
  0x29   :  { %102 = vperm.xlu1 %227, %v15_v0  }
  0x2b   :  { %234 = vset.pattern.permute.xlu0 %v265_v10 }
  0x2c   :  { %188 = vperm.xlu0 %234, %v13_v4  }
  0x2d   :  { %228 = vset.pattern.permute.xlu1 %v263_v8 }
  0x2e   :  { %122 = vperm.xlu1 %228, %v13_v4  }
  0x32   :  { %230 = vset.pattern.permute.xlu1 %v262_v7 }
  0x33   :  { %106 = vperm.xlu1 %230, %v16_v6  }
  0x37   :  { %231 = vset.pattern.permute.xlu1 %v263_v8 }
  0x38   :  { %130 = vperm.xlu1 %231, %v15_v0  }
  0x3c   :  { %232 = vset.pattern.permute.xlu1 %v264_v9 }
  0x3d   :  { %154 = vperm.xlu1 %232, %v13_v4  }
  0x41   :  { %162 = vperm.xlu1 %232, %v15_v0  }
  0x45   :  { %166 = vperm.xlu1 %232, %v16_v6  }
  0x81   :  { %v30_v11 = vpop.permute.xlu1 %29  ;;  %v51_v14 = vpop.permute.xlu0 %50 }
  0x82   :  { %v43_v49 = vmul.f32 %v40_v29, %v30_v11 }
  0x86   :  { %v47_v12 = vpop.permute.xlu1 %46  ;;  %v20_v16 = vpop.permute.xlu0 %19 }
  0x87   :  { %v41_v36 = vmul.f32 %v40_v29, %v20_v16 }
  0x89   :  { %v61_v44 = vadd.f32 %v47_v12, %v41_v36 }
  0x8a   :  { %v25_v19 = vpop.permute.xlu0 %24 }
  0x8b   :  { %v67_v13 = vpop.permute.xlu1 %66  ;;  %v42_v31 = vmul.f32 %v40_v29, %v25_v19 }
  0x8c   :  { %v85_v41 = vmul.f32 %v84_v33, %v67_v13 }
  0x8d   :  { %v62_v37 = vadd.f32 %v51_v14, %v42_v31 }
  0x8e   :  { %v35_v23 = vpop.permute.xlu0 %34  ;;  %v89_v50 = vadd.f32 %v85_v41, %v61_v44 }
  0x8f   :  { %v71_v15 = vpop.permute.xlu1 %70  ;;  %v44_v46 = vmul.f32 %v40_v29, %v35_v23 }
  0x90   :  { %v86_v38 = vmul.f32 %v84_v33, %v71_v15 }
  0x92   :  { %v90_v47 = vadd.f32 %v86_v38, %v62_v37 }
  0x93   :  { %v95_v28 = vpop.permute.xlu0 %94 }
  0x94   :  { %v55_v17 = vpop.permute.xlu1 %54  ;;  %v113_v48 = vmul.f32 %v112_v39, %v95_v28 }
  0x95   :  { %v63_v56 = vadd.f32 %v55_v17, %v43_v49 }
  0x96   :  { %v117_v57 = vadd.f32 %v113_v48, %v89_v50 }
  0x98   :  { %v79_v34 = vpop.permute.xlu0 %78 }
  0x99   :  { %v75_v18 = vpop.permute.xlu1 %74  ;;  %v88_v58 = vmul.f32 %v84_v33, %v79_v34 }
  0x9a   :  { %v87_v52 = vmul.f32 %v84_v33, %v75_v18 }
  0x9c   :  { %v91_v62 = vadd.f32 %v87_v52, %v63_v56 }
  0x9d   :  { %v127_v45 = vpop.permute.xlu0 %126 }
  0x9e   :  { %v99_v21 = vpop.permute.xlu1 %98  ;;  %v142_v53 = vmul.f32 %v140_v42, %v127_v45 }
  0x9f   :  { %v114_v43 = vmul.f32 %v112_v39, %v99_v21 }
  0xa1   :  { %v118_v54 = vadd.f32 %v114_v43, %v90_v47  ;;  %v135_v61 = vpop.permute.xlu0 %134 }
  0xa2   :  { %v144_v6 = vmul.f32 %v140_v42, %v135_v61 }
  0xa3   :  { %v59_v25 = vpop.permute.xlu1 %58  ;;  %v146_v63 = vadd.f32 %v142_v53, %v118_v54 }
  0xa4   :  { %v64_v59 = vadd.f32 %v59_v25, %v44_v46 }
  0xa5   :  { %v150_v7 = vmax.f32 %v146_v63, 0.0 }
  0xa6   :  { %v92_v4 = vadd.f32 %v88_v58, %v64_v59  ;;  %v159_v11 = vpop.permute.xlu0 %158 }
  0xa7   :  { %v170_v14 = vmul.f32 %v159_v11, %v150_v7 }
  0xa8   :  { %v103_v30 = vpop.permute.xlu1 %102 }
  0xa9   :  { %v115_v60 = vmul.f32 %v112_v39, %v103_v30  ;;  %v175_v20 = vsel %vm173_vm0, %v170_v14, 0.0 }
  0xab   :  { %v119_v5 = vadd.f32 %v115_v60, %v91_v62  ;;  %v189_v34 = vpop.permute.xlu0 %188 }
  0xad   :  { %v123_v40 = vpop.permute.xlu1 %122 }
  0xae   :  { %v141_v55 = vmul.f32 %v140_v42, %v123_v40 }
  0xb0   :  { %v145_v0 = vadd.f32 %v141_v55, %v117_v57 }
  0xb2   :  { %v107_v51 = vpop.permute.xlu1 %106  ;;  %v149_v10 = vmax.f32 %v145_v0, 0.0 }
  0xb3   :  { %v116_v1 = vmul.f32 %v112_v39, %v107_v51 }
  0xb5   :  { %v120_v8 = vadd.f32 %v116_v1, %v92_v4 }
  0xb7   :  { %v131_v2 = vpop.permute.xlu1 %130  ;;  %v148_v16 = vadd.f32 %v144_v6, %v120_v8 }
  0xb8   :  { %v143_v3 = vmul.f32 %v140_v42, %v131_v2 }
  0xb9   :  { %v152_v22 = vmax.f32 %v148_v16, 0.0 }
  0xba   :  { %v147_v9 = vadd.f32 %v143_v3, %v119_v5 }
  0xbc   :  { %v155_v12 = vpop.permute.xlu1 %154  ;;  %v151_v15 = vmax.f32 %v147_v9, 0.0 }
  0xbd   :  { %v169_v13 = vmul.f32 %v155_v12, %v149_v10 }
  0xbf   :  { %v174_v18 = vsel %vm173_vm0, %v169_v13, 0.0 }
  0xc0   :  { %v163_v17 = vpop.permute.xlu1 %162  ;;  %v176_v23 = vadd.f32 %v175_v20, %v174_v18 }
  0xc1   :  { %v171_v19 = vmul.f32 %v163_v17, %v151_v15 }
  0xc3   :  { %v177_v21 = vsel %vm173_vm0, %v171_v19, 0.0 }
  0xc4   :  { %v167_v24 = vpop.permute.xlu1 %166  ;;  %v178_v26 = vadd.f32 %v177_v21, %v176_v23 }
  0xc5   :  { %v172_v25 = vmul.f32 %v167_v24, %v152_v22 }
  0xc7   :  { %v179_v27 = vsel %vm173_vm0, %v172_v25, 0.0 }
  0xc8   :  { %v180_v28 = vadd.f32 %v179_v27, %v178_v26 }
  0xca   :  { %v181_v29 = vrot.slane %v180_v28, 4 }
  0xcc   :  { %v182_v30 = vadd.f32 %v181_v29, %v180_v28 }
  0xce   :  { %v183_v31 = vrot.slane %v182_v30, 2 }
  0xd0   :  { %v184_v32 = vadd.f32 %v183_v31, %v182_v30 }
  0xd2   :  { %v185_v33 = vrot.slane %v184_v32, 1 }
  0xd4   :  { %v186_v35 = vadd.f32 %v185_v33, %v184_v32 }
  0xd6   :  { %v191_v36 = vadd.f32 %v189_v34, %v186_v35 }
  0xd8   :  { %193 = vst.msk [vmem:[#allocation2] sm:$0x1] %vm192_vm1, %v191_v36 }
  0xd9   :  { %246 = shalt.err (!%p243_p4)
}
  0xda   :  { %s247_s23 = scalar_lea.hbm %s311_s2, 16 }
  0xdb   :  { %p248_p5 = scmp.ne.s32.totalorder %s311_s2, %s247_s23  ;;  %p251_p6 = scmp.lt.u32.totalorder %s247_s23, %s311_s2 }
  0xdd   :  { %p253_p7 = pnand %p251_p6, %p248_p5 }
  0xdf   :  { %256 = shalt.err (!%p253_p7)
}
  0xe0   :  { %203 = dma.vmem_to_hbm [thread:$0]  %s201_s18, 16, %s311_s2, [#allocation3]  }
  0xe1   :  { %257 = dma.done.wait [#allocation3], 16  }
  0xe2   :  { %258 = vsyncadd [#allocation3], 4294967280 }
  0xe3   :  { %207 = vsyncpa [#allocation3], 1 }

</bundles_post_ra>
